<compile_context>
chip_gen: v5e
topology: v5e:2x2
jax: 0.10.0
libtpu: 0.0.40
codegen_flags: <defaults>
</compile_context>

<pallas_src>
import functools

import jax
import jax.numpy as jnp
from jax.experimental import pallas as pl
from jax.experimental.pallas import tpu as pltpu


# --------------------------------------------------------------------------- #
# Kernel
# --------------------------------------------------------------------------- #
def _sar_kernel(x_ref,
                w1_ref, b1_ref,
                w2_ref, b2_ref,
                w3_ref, b3_ref,
                w4_ref, b4_ref,
                xr_ref, z_ref):
    """Full autoencoder forward for one batch tile, entirely in VMEM.

    Weights arrive as bf16, biases as f32. All matmuls take bf16 operands and
    accumulate in f32 on the MXU; bias add and ReLU run in f32 on the VPU.
    """
    # ---- encoder ----
    x = x_ref[...].astype(jnp.bfloat16)
    h1 = jnp.dot(x, w1_ref[...], preferred_element_type=jnp.float32) + b1_ref[...]
    h1 = jnp.maximum(h1, 0.0)

    z = jnp.dot(h1.astype(jnp.bfloat16), w2_ref[...],
                preferred_element_type=jnp.float32) + b2_ref[...]
    z = jnp.maximum(z, 0.0)

    # ---- decoder ----
    h3 = jnp.dot(z.astype(jnp.bfloat16), w3_ref[...],
                 preferred_element_type=jnp.float32) + b3_ref[...]
    h3 = jnp.maximum(h3, 0.0)

    xr = jnp.dot(h3.astype(jnp.bfloat16), w4_ref[...],
                 preferred_element_type=jnp.float32) + b4_ref[...]

    xr_ref[...] = xr.astype(xr_ref.dtype)
    z_ref[...] = z.astype(z_ref.dtype)


# --------------------------------------------------------------------------- #
# Tiling helpers
# --------------------------------------------------------------------------- #
def _round_up(n, m):
    return ((n + m - 1) // m) * m


def _pick_block_b(B, block_b):
    """Batch-tile rows: small batches clamp to sublane granularity (8);
    mid/large batches get >= 2 grid steps (v7x megacore) with 8-row alignment."""
    if B <= 128:
        return max(8, _round_up(B, 8))
    n_tiles = max(2, pl.cdiv(B, block_b))
    return min(block_b, max(128, _round_up(pl.cdiv(B, n_tiles), 8)))


# --------------------------------------------------------------------------- #
# pallas_call wrapper
# --------------------------------------------------------------------------- #
@functools.partial(jax.jit, static_argnames=("block_b", "weight_buffers"))
def _forward(x, w1, b1, w2, b2, w3, b3, w4, b4, *, block_b, weight_buffers):
    B, D = x.shape
    H = w1.shape[1]

    bb = _pick_block_b(B, block_b)
    grid_b = pl.cdiv(B, bb)
    Bp = grid_b * bb
    x_p = x if Bp == B else jnp.pad(x, ((0, Bp - B), (0, 0)))

    # Weights/biases are block-index-constant: Pallas skips redundant DMAs after
    # step 0; single-buffering (Buffered(1)) halves their resident VMEM.
    if weight_buffers is None:
        def const_spec(shape):
            return pl.BlockSpec(shape, lambda i: (0,) * len(shape))
    else:
        pm = pl.Buffered(weight_buffers)

        def const_spec(shape):
            return pl.BlockSpec(shape, lambda i: (0,) * len(shape),
                                pipeline_mode=pm)

    in_specs = [
        pl.BlockSpec((bb, D), lambda i: (i, 0)),          # x tile
        const_spec((D, H)), const_spec((1, H)),           # w1, b1
        const_spec((H, H)), const_spec((1, H)),           # w2, b2
        const_spec((H, H)), const_spec((1, H)),           # w3, b3
        const_spec((H, D)), const_spec((1, D)),           # w4, b4
    ]
    out_specs = [
        pl.BlockSpec((bb, D), lambda i: (i, 0)),          # x_recon tile
        pl.BlockSpec((bb, H), lambda i: (i, 0)),          # z tile
    ]

    # VMEM budget sized from the actual footprint (2x headroom, 32 MiB floor).
    n_wbuf = weight_buffers if weight_buffers is not None else 2
    weight_bytes = 2 * (D * H + 2 * H * H + H * D)        # bf16, one copy
    bias_bytes = 4 * (3 * H + D)
    resident = n_wbuf * (weight_bytes + bias_bytes)
    resident += 2 * bb * D * 4                            # x tile (double buffered)
    resident += 2 * bb * (D + H) * 4                      # output tiles
    resident += bb * (3 * H + D) * 6                      # f32 + bf16 intermediates
    vmem_limit = int(min(max(2 * resident, 32 * 1024 * 1024), 100 * 1024 * 1024))

    # Advisory cost estimate for the XLA scheduler.
    flops = 4 * Bp * (D * H + H * H)                      # 2 flops/MAC, 4 matmuls
    io_bytes = 4 * (Bp * D + Bp * D + Bp * H)             # x in, x_recon + z out
    cost = pl.CostEstimate(flops=flops, transcendentals=0,
                           bytes_accessed=io_bytes + weight_bytes + bias_bytes)

    x_recon, z = pl.pallas_call(
        _sar_kernel,
        out_shape=(
            jax.ShapeDtypeStruct((Bp, D), x.dtype),
            jax.ShapeDtypeStruct((Bp, H), x.dtype),
        ),
        grid_spec=pltpu.PrefetchScalarGridSpec(
            num_scalar_prefetch=0,
            grid=(grid_b,),
            in_specs=in_specs,
            out_specs=out_specs,
        ),
        compiler_params=pltpu.CompilerParams(
            dimension_semantics=("parallel",),             # megacore on v7x
            vmem_limit_bytes=vmem_limit,
        ),
        cost_estimate=cost,
    )(x_p, w1, b1, w2, b2, w3, b3, w4, b4)

    if Bp != B:
        x_recon = x_recon[:B]
        z = z[:B]
    return x_recon, z


# --------------------------------------------------------------------------- #
# Public API
# --------------------------------------------------------------------------- #
def prepare_params(params):
    """Cast weights to bf16 and biases to f32 (1, out) once; idempotent."""
    out = {}
    for i in range(1, 5):
        w = params[f"w{i}"]
        b = params[f"b{i}"].reshape(1, -1)
        out[f"w{i}"] = w if w.dtype == jnp.bfloat16 else w.astype(jnp.bfloat16)
        out[f"b{i}"] = b if b.dtype == jnp.float32 else b.astype(jnp.float32)
    return out


_WEIGHT_BUFFERS = [1]  # flips to [None] if Buffered(1) is rejected by this runtime


def semantic_attribute_reconstruction(x, params, *, block_b=512):
    """x: [B, input_dim] f32; params: w1..w4 [in,out], b1..b4 [out] or [1,out].

    Returns (x_recon [B, input_dim] f32, z [B, hidden_dim] f32).
    """
    p = prepare_params(params)
    args = (x, p["w1"], p["b1"], p["w2"], p["b2"],
            p["w3"], p["b3"], p["w4"], p["b4"])
    if _WEIGHT_BUFFERS[0] is not None:
        try:
            return _forward(*args, block_b=block_b,
                            weight_buffers=_WEIGHT_BUFFERS[0])
        except Exception:
            _WEIGHT_BUFFERS[0] = None  # fall back to default double buffering
    return _forward(*args, block_b=block_b, weight_buffers=None)


def init_params(key, input_dim, hidden_dim, dtype=jnp.float32):
    """PyTorch nn.Linear default init: U(-1/sqrt(fan_in), 1/sqrt(fan_in))."""
    dims = [(input_dim, hidden_dim),   # encoder.0
            (hidden_dim, hidden_dim),  # encoder.2
            (hidden_dim, hidden_dim),  # decoder.0
            (hidden_dim, input_dim)]   # decoder.2
    params = {}
    for idx, (fan_in, fan_out) in enumerate(dims, start=1):
        key, kw, kb = jax.random.split(key, 3)
        bound = 1.0 / jnp.sqrt(fan_in)
        params[f"w{idx}"] = jax.random.uniform(
            kw, (fan_in, fan_out), dtype, minval=-bound, maxval=bound)
        params[f"b{idx}"] = jax.random.uniform(
            kb, (1, fan_out), dtype, minval=-bound, maxval=bound)
    return params


def _reference_forward(x, p):
    """Pure-JAX reference matching the kernel's bf16-operand / f32-accumulate math."""
    def lin(a, w, b):
        return jnp.dot(a.astype(jnp.bfloat16), w.astype(jnp.bfloat16),
                       preferred_element_type=jnp.float32) + b.astype(jnp.float32)
    h1 = jnp.maximum(lin(x, p["w1"], p["b1"]), 0.0)
    z = jnp.maximum(lin(h1, p["w2"], p["b2"]), 0.0)
    h3 = jnp.maximum(lin(z, p["w3"], p["b3"]), 0.0)
    xr = lin(h3, p["w4"], p["b4"])
    return xr, z


if __name__ == "__main__":
    # Small shapes consistent with the module (input_dim=768, hidden=512 scaled down).
    INPUT_DIM = 256
    HIDDEN_DIM = 128

    key = jax.random.PRNGKey(0)
    key, kx1, kx2 = jax.random.split(key, 3)
    params = init_params(key, INPUT_DIM, HIDDEN_DIM)

    # Case 1: tiny batch -> exercises the small-batch clamp (no padding waste).
    x_small = jax.random.normal(kx1, (8, INPUT_DIM), dtype=jnp.float32)
    xr_s, z_s = semantic_attribute_reconstruction(x_small, params)
    jax.block_until_ready((xr_s, z_s))

    # Case 2: mid batch, not a multiple of the tile -> exercises padding +
    # the >=2-grid-step (megacore) path.
    x_mid = jax.random.normal(kx2, (300, INPUT_DIM), dtype=jnp.float32)
    xr_m, z_m = semantic_attribute_reconstruction(x_mid, params)
    jax.block_until_ready((xr_m, z_m))

    # Sanity-check against a pure-JAX reference using the same bf16 MXU operands.
    for x_in, xr, z in ((x_small, xr_s, z_s), (x_mid, xr_m, z_m)):
        xr_ref, z_ref = _reference_forward(x_in, params)
        assert xr.shape == (x_in.shape[0], INPUT_DIM)
        assert z.shape == (x_in.shape[0], HIDDEN_DIM)
        assert jnp.allclose(xr, xr_ref, atol=1e-2, rtol=1e-2)
        assert jnp.allclose(z, z_ref, atol=1e-2, rtol=1e-2)

    print("KERNEL_OK")
</pallas_src>

<mosaic_0001>
module attributes {stable_mosaic.version = 11 : i64} {
  func.func @_sar_kernel(%arg0: i32, %arg1: memref<8x256xf32, #tpu.memory_space<vmem>>, %arg2: memref<256x128xbf16, #tpu.memory_space<vmem>>, %arg3: memref<1x128xf32, #tpu.memory_space<vmem>>, %arg4: memref<128x128xbf16, #tpu.memory_space<vmem>>, %arg5: memref<1x128xf32, #tpu.memory_space<vmem>>, %arg6: memref<128x128xbf16, #tpu.memory_space<vmem>>, %arg7: memref<1x128xf32, #tpu.memory_space<vmem>>, %arg8: memref<128x256xbf16, #tpu.memory_space<vmem>>, %arg9: memref<1x256xf32, #tpu.memory_space<vmem>>, %arg10: memref<8x256xf32, #tpu.memory_space<vmem>>, %arg11: memref<8x128xf32, #tpu.memory_space<vmem>>) attributes {dimension_semantics = [#tpu.dimension_semantics<parallel>], iteration_bounds = array<i64: 1>, scalar_prefetch = 0 : i64, scratch_operands = 0 : i64, tpu.core_type = #tpu.core_type<tc>, window_params = [{transform_indices = @transform_0, window_bounds = array<i64: 8, 256>}, {pipeline_mode = #tpu.pipeline_mode<synchronous>, transform_indices = @transform_1, window_bounds = array<i64: 256, 128>}, {pipeline_mode = #tpu.pipeline_mode<synchronous>, transform_indices = @transform_2, window_bounds = array<i64: 1, 128>}, {pipeline_mode = #tpu.pipeline_mode<synchronous>, transform_indices = @transform_3, window_bounds = array<i64: 128, 128>}, {pipeline_mode = #tpu.pipeline_mode<synchronous>, transform_indices = @transform_4, window_bounds = array<i64: 1, 128>}, {pipeline_mode = #tpu.pipeline_mode<synchronous>, transform_indices = @transform_5, window_bounds = array<i64: 128, 128>}, {pipeline_mode = #tpu.pipeline_mode<synchronous>, transform_indices = @transform_6, window_bounds = array<i64: 1, 128>}, {pipeline_mode = #tpu.pipeline_mode<synchronous>, transform_indices = @transform_7, window_bounds = array<i64: 128, 256>}, {pipeline_mode = #tpu.pipeline_mode<synchronous>, transform_indices = @transform_8, window_bounds = array<i64: 1, 256>}, {transform_indices = @transform_9, window_bounds = array<i64: 8, 256>}, {transform_indices = @transform_10, window_bounds = array<i64: 8, 128>}]} {
    %c0 = arith.constant 0 : index
    %c0_0 = arith.constant 0 : index
    %0 = vector.load %arg1[%c0, %c0_0] : memref<8x256xf32, #tpu.memory_space<vmem>>, vector<8x256xf32>
    %1 = arith.truncf %0 : vector<8x256xf32> to vector<8x256xbf16>
    %c0_1 = arith.constant 0 : index
    %c0_2 = arith.constant 0 : index
    %2 = vector.load %arg2[%c0_1, %c0_2] : memref<256x128xbf16, #tpu.memory_space<vmem>>, vector<256x128xbf16>
    %cst = arith.constant dense<0.000000e+00> : vector<8x128xf32>
    %3 = tpu.matmul %1, %2, %cst {dimension_numbers = #tpu.dot_dimension_numbers<[1], [0], [0], [1], [0, 0, 1, 1], [], []>} : vector<8x256xbf16>, vector<256x128xbf16>, vector<8x128xf32> -> vector<8x128xf32>
    %c0_3 = arith.constant 0 : index
    %c0_4 = arith.constant 0 : index
    %4 = vector.load %arg3[%c0_3, %c0_4] : memref<1x128xf32, #tpu.memory_space<vmem>>, vector<1x128xf32>
    %5 = vector.broadcast %4 : vector<1x128xf32> to vector<8x128xf32>
    %6 = arith.addf %3, %5 : vector<8x128xf32>
    %cst_5 = arith.constant 0.000000e+00 : f32
    %7 = vector.broadcast %cst_5 : f32 to vector<8x128xf32>
    %8 = arith.maximumf %6, %7 : vector<8x128xf32>
    %9 = arith.truncf %8 : vector<8x128xf32> to vector<8x128xbf16>
    %c0_6 = arith.constant 0 : index
    %c0_7 = arith.constant 0 : index
    %10 = vector.load %arg4[%c0_6, %c0_7] : memref<128x128xbf16, #tpu.memory_space<vmem>>, vector<128x128xbf16>
    %cst_8 = arith.constant dense<0.000000e+00> : vector<8x128xf32>
    %11 = tpu.matmul %9, %10, %cst_8 {dimension_numbers = #tpu.dot_dimension_numbers<[1], [0], [0], [1], [0, 0, 1, 1], [], []>} : vector<8x128xbf16>, vector<128x128xbf16>, vector<8x128xf32> -> vector<8x128xf32>
    %c0_9 = arith.constant 0 : index
    %c0_10 = arith.constant 0 : index
    %12 = vector.load %arg5[%c0_9, %c0_10] : memref<1x128xf32, #tpu.memory_space<vmem>>, vector<1x128xf32>
    %13 = vector.broadcast %12 : vector<1x128xf32> to vector<8x128xf32>
    %14 = arith.addf %11, %13 : vector<8x128xf32>
    %cst_11 = arith.constant 0.000000e+00 : f32
    %15 = vector.broadcast %cst_11 : f32 to vector<8x128xf32>
    %16 = arith.maximumf %14, %15 : vector<8x128xf32>
    %17 = arith.truncf %16 : vector<8x128xf32> to vector<8x128xbf16>
    %c0_12 = arith.constant 0 : index
    %c0_13 = arith.constant 0 : index
    %18 = vector.load %arg6[%c0_12, %c0_13] : memref<128x128xbf16, #tpu.memory_space<vmem>>, vector<128x128xbf16>
    %cst_14 = arith.constant dense<0.000000e+00> : vector<8x128xf32>
    %19 = tpu.matmul %17, %18, %cst_14 {dimension_numbers = #tpu.dot_dimension_numbers<[1], [0], [0], [1], [0, 0, 1, 1], [], []>} : vector<8x128xbf16>, vector<128x128xbf16>, vector<8x128xf32> -> vector<8x128xf32>
    %c0_15 = arith.constant 0 : index
    %c0_16 = arith.constant 0 : index
    %20 = vector.load %arg7[%c0_15, %c0_16] : memref<1x128xf32, #tpu.memory_space<vmem>>, vector<1x128xf32>
    %21 = vector.broadcast %20 : vector<1x128xf32> to vector<8x128xf32>
    %22 = arith.addf %19, %21 : vector<8x128xf32>
    %cst_17 = arith.constant 0.000000e+00 : f32
    %23 = vector.broadcast %cst_17 : f32 to vector<8x128xf32>
    %24 = arith.maximumf %22, %23 : vector<8x128xf32>
    %25 = arith.truncf %24 : vector<8x128xf32> to vector<8x128xbf16>
    %c0_18 = arith.constant 0 : index
    %c0_19 = arith.constant 0 : index
    %26 = vector.load %arg8[%c0_18, %c0_19] : memref<128x256xbf16, #tpu.memory_space<vmem>>, vector<128x256xbf16>
    %cst_20 = arith.constant dense<0.000000e+00> : vector<8x256xf32>
    %27 = tpu.matmul %25, %26, %cst_20 {dimension_numbers = #tpu.dot_dimension_numbers<[1], [0], [0], [1], [0, 0, 1, 1], [], []>} : vector<8x128xbf16>, vector<128x256xbf16>, vector<8x256xf32> -> vector<8x256xf32>
    %c0_21 = arith.constant 0 : index
    %c0_22 = arith.constant 0 : index
    %28 = vector.load %arg9[%c0_21, %c0_22] : memref<1x256xf32, #tpu.memory_space<vmem>>, vector<1x256xf32>
    %29 = vector.broadcast %28 : vector<1x256xf32> to vector<8x256xf32>
    %30 = arith.addf %27, %29 : vector<8x256xf32>
    %c0_23 = arith.constant 0 : index
    %c0_24 = arith.constant 0 : index
    %31 = vector.load %arg10[%c0_23, %c0_24] : memref<8x256xf32, #tpu.memory_space<vmem>>, vector<8x256xf32>
    tpu.vector_store %arg10[%c0_23, %c0_24], %30 {strides = array<i32>} : memref<8x256xf32, #tpu.memory_space<vmem>>, vector<8x256xf32>,
    %c0_25 = arith.constant 0 : index
    %c0_26 = arith.constant 0 : index
    %32 = vector.load %arg11[%c0_25, %c0_26] : memref<8x128xf32, #tpu.memory_space<vmem>>, vector<8x128xf32>
    tpu.vector_store %arg11[%c0_25, %c0_26], %16 {strides = array<i32>} : memref<8x128xf32, #tpu.memory_space<vmem>>, vector<8x128xf32>,
    return
  }
  func.func @transform_0(%arg0: i32) -> (i32, i32) {
    %c0_i32 = arith.constant 0 : i32
    %c0_i32_0 = arith.constant 0 : i32
    return %arg0, %c0_i32 : i32, i32
  }
  func.func @transform_1(%arg0: i32) -> (i32, i32) {
    %c0_i32 = arith.constant 0 : i32
    %c0_i32_0 = arith.constant 0 : i32
    %c0_i32_1 = arith.constant 0 : i32
    return %c0_i32, %c0_i32_0 : i32, i32
  }
  func.func @transform_2(%arg0: i32) -> (i32, i32) {
    %c0_i32 = arith.constant 0 : i32
    %c0_i32_0 = arith.constant 0 : i32
    %c0_i32_1 = arith.constant 0 : i32
    return %c0_i32, %c0_i32_0 : i32, i32
  }
  func.func @transform_3(%arg0: i32) -> (i32, i32) {
    %c0_i32 = arith.constant 0 : i32
    %c0_i32_0 = arith.constant 0 : i32
    %c0_i32_1 = arith.constant 0 : i32
    return %c0_i32, %c0_i32_0 : i32, i32
  }
  func.func @transform_4(%arg0: i32) -> (i32, i32) {
    %c0_i32 = arith.constant 0 : i32
    %c0_i32_0 = arith.constant 0 : i32
    %c0_i32_1 = arith.constant 0 : i32
    return %c0_i32, %c0_i32_0 : i32, i32
  }
  func.func @transform_5(%arg0: i32) -> (i32, i32) {
    %c0_i32 = arith.constant 0 : i32
    %c0_i32_0 = arith.constant 0 : i32
    %c0_i32_1 = arith.constant 0 : i32
    return %c0_i32, %c0_i32_0 : i32, i32
  }
  func.func @transform_6(%arg0: i32) -> (i32, i32) {
    %c0_i32 = arith.constant 0 : i32
    %c0_i32_0 = arith.constant 0 : i32
    %c0_i32_1 = arith.constant 0 : i32
    return %c0_i32, %c0_i32_0 : i32, i32
  }
  func.func @transform_7(%arg0: i32) -> (i32, i32) {
    %c0_i32 = arith.constant 0 : i32
    %c0_i32_0 = arith.constant 0 : i32
    %c0_i32_1 = arith.constant 0 : i32
    return %c0_i32, %c0_i32_0 : i32, i32
  }
  func.func @transform_8(%arg0: i32) -> (i32, i32) {
    %c0_i32 = arith.constant 0 : i32
    %c0_i32_0 = arith.constant 0 : i32
    %c0_i32_1 = arith.constant 0 : i32
    return %c0_i32, %c0_i32_0 : i32, i32
  }
  func.func @transform_9(%arg0: i32) -> (i32, i32) {
    %c0_i32 = arith.constant 0 : i32
    %c0_i32_0 = arith.constant 0 : i32
    return %arg0, %c0_i32 : i32, i32
  }
  func.func @transform_10(%arg0: i32) -> (i32, i32) {
    %c0_i32 = arith.constant 0 : i32
    %c0_i32_0 = arith.constant 0 : i32
    return %arg0, %c0_i32 : i32, i32
  }
}

module attributes {stable_mosaic.version = 11 : i64} {
  func.func @_sar_kernel(%arg0: i32, %arg1: memref<8x256xf32, #tpu.memory_space<vmem>>, %arg2: memref<256x128xbf16, #tpu.memory_space<vmem>>, %arg3: memref<1x128xf32, #tpu.memory_space<vmem>>, %arg4: memref<128x128xbf16, #tpu.memory_space<vmem>>, %arg5: memref<1x128xf32, #tpu.memory_space<vmem>>, %arg6: memref<128x128xbf16, #tpu.memory_space<vmem>>, %arg7: memref<1x128xf32, #tpu.memory_space<vmem>>, %arg8: memref<128x256xbf16, #tpu.memory_space<vmem>>, %arg9: memref<1x256xf32, #tpu.memory_space<vmem>>, %arg10: memref<8x256xf32, #tpu.memory_space<vmem>>, %arg11: memref<8x128xf32, #tpu.memory_space<vmem>>) attributes {dimension_semantics = [#tpu.dimension_semantics<parallel>], iteration_bounds = array<i64: 1>, scalar_prefetch = 0 : i64, scratch_operands = 0 : i64, tpu.core_type = #tpu.core_type<tc>, window_params = [{transform_indices = @transform_0, window_bounds = array<i64: 8, 256>}, {pipeline_mode = #tpu.pipeline_mode<synchronous>, transform_indices = @transform_1, window_bounds = array<i64: 256, 128>}, {pipeline_mode = #tpu.pipeline_mode<synchronous>, transform_indices = @transform_2, window_bounds = array<i64: 1, 128>}, {pipeline_mode = #tpu.pipeline_mode<synchronous>, transform_indices = @transform_3, window_bounds = array<i64: 128, 128>}, {pipeline_mode = #tpu.pipeline_mode<synchronous>, transform_indices = @transform_4, window_bounds = array<i64: 1, 128>}, {pipeline_mode = #tpu.pipeline_mode<synchronous>, transform_indices = @transform_5, window_bounds = array<i64: 128, 128>}, {pipeline_mode = #tpu.pipeline_mode<synchronous>, transform_indices = @transform_6, window_bounds = array<i64: 1, 128>}, {pipeline_mode = #tpu.pipeline_mode<synchronous>, transform_indices = @transform_7, window_bounds = array<i64: 128, 256>}, {pipeline_mode = #tpu.pipeline_mode<synchronous>, transform_indices = @transform_8, window_bounds = array<i64: 1, 256>}, {transform_indices = @transform_9, window_bounds = array<i64: 8, 256>}, {transform_indices = @transform_10, window_bounds = array<i64: 8, 128>}]} {
    %c0 = arith.constant 0 : index
    %c0_0 = arith.constant 0 : index
    %0 = vector.load %arg1[%c0, %c0_0] : memref<8x256xf32, #tpu.memory_space<vmem>>, vector<8x256xf32>
    %1 = arith.truncf %0 : vector<8x256xf32> to vector<8x256xbf16>
    %c0_1 = arith.constant 0 : index
    %c0_2 = arith.constant 0 : index
    %2 = vector.load %arg2[%c0_1, %c0_2] : memref<256x128xbf16, #tpu.memory_space<vmem>>, vector<256x128xbf16>
    %cst = arith.constant dense<0.000000e+00> : vector<8x128xf32>
    %3 = tpu.matmul %1, %2, %cst {dimension_numbers = #tpu.dot_dimension_numbers<[1], [0], [0], [1], [0, 0, 1, 1], [], []>} : vector<8x256xbf16>, vector<256x128xbf16>, vector<8x128xf32> -> vector<8x128xf32>
    %c0_3 = arith.constant 0 : index
    %c0_4 = arith.constant 0 : index
    %4 = vector.load %arg3[%c0_3, %c0_4] : memref<1x128xf32, #tpu.memory_space<vmem>>, vector<1x128xf32>
    %5 = vector.broadcast %4 : vector<1x128xf32> to vector<8x128xf32>
    %6 = arith.addf %3, %5 : vector<8x128xf32>
    %cst_5 = arith.constant 0.000000e+00 : f32
    %7 = vector.broadcast %cst_5 : f32 to vector<8x128xf32>
    %8 = arith.maximumf %6, %7 : vector<8x128xf32>
    %9 = arith.truncf %8 : vector<8x128xf32> to vector<8x128xbf16>
    %c0_6 = arith.constant 0 : index
    %c0_7 = arith.constant 0 : index
    %10 = vector.load %arg4[%c0_6, %c0_7] : memref<128x128xbf16, #tpu.memory_space<vmem>>, vector<128x128xbf16>
    %cst_8 = arith.constant dense<0.000000e+00> : vector<8x128xf32>
    %11 = tpu.matmul %9, %10, %cst_8 {dimension_numbers = #tpu.dot_dimension_numbers<[1], [0], [0], [1], [0, 0, 1, 1], [], []>} : vector<8x128xbf16>, vector<128x128xbf16>, vector<8x128xf32> -> vector<8x128xf32>
    %c0_9 = arith.constant 0 : index
    %c0_10 = arith.constant 0 : index
    %12 = vector.load %arg5[%c0_9, %c0_10] : memref<1x128xf32, #tpu.memory_space<vmem>>, vector<1x128xf32>
    %13 = vector.broadcast %12 : vector<1x128xf32> to vector<8x128xf32>
    %14 = arith.addf %11, %13 : vector<8x128xf32>
    %cst_11 = arith.constant 0.000000e+00 : f32
    %15 = vector.broadcast %cst_11 : f32 to vector<8x128xf32>
    %16 = arith.maximumf %14, %15 : vector<8x128xf32>
    %17 = arith.truncf %16 : vector<8x128xf32> to vector<8x128xbf16>
    %c0_12 = arith.constant 0 : index
    %c0_13 = arith.constant 0 : index
    %18 = vector.load %arg6[%c0_12, %c0_13] : memref<128x128xbf16, #tpu.memory_space<vmem>>, vector<128x128xbf16>
    %cst_14 = arith.constant dense<0.000000e+00> : vector<8x128xf32>
    %19 = tpu.matmul %17, %18, %cst_14 {dimension_numbers = #tpu.dot_dimension_numbers<[1], [0], [0], [1], [0, 0, 1, 1], [], []>} : vector<8x128xbf16>, vector<128x128xbf16>, vector<8x128xf32> -> vector<8x128xf32>
    %c0_15 = arith.constant 0 : index
    %c0_16 = arith.constant 0 : index
    %20 = vector.load %arg7[%c0_15, %c0_16] : memref<1x128xf32, #tpu.memory_space<vmem>>, vector<1x128xf32>
    %21 = vector.broadcast %20 : vector<1x128xf32> to vector<8x128xf32>
    %22 = arith.addf %19, %21 : vector<8x128xf32>
    %cst_17 = arith.constant 0.000000e+00 : f32
    %23 = vector.broadcast %cst_17 : f32 to vector<8x128xf32>
    %24 = arith.maximumf %22, %23 : vector<8x128xf32>
    %25 = arith.truncf %24 : vector<8x128xf32> to vector<8x128xbf16>
    %c0_18 = arith.constant 0 : index
    %c0_19 = arith.constant 0 : index
    %26 = vector.load %arg8[%c0_18, %c0_19] : memref<128x256xbf16, #tpu.memory_space<vmem>>, vector<128x256xbf16>
    %cst_20 = arith.constant dense<0.000000e+00> : vector<8x256xf32>
    %27 = tpu.matmul %25, %26, %cst_20 {dimension_numbers = #tpu.dot_dimension_numbers<[1], [0], [0], [1], [0, 0, 1, 1], [], []>} : vector<8x128xbf16>, vector<128x256xbf16>, vector<8x256xf32> -> vector<8x256xf32>
    %c0_21 = arith.constant 0 : index
    %c0_22 = arith.constant 0 : index
    %28 = vector.load %arg9[%c0_21, %c0_22] : memref<1x256xf32, #tpu.memory_space<vmem>>, vector<1x256xf32>
    %29 = vector.broadcast %28 : vector<1x256xf32> to vector<8x256xf32>
    %30 = arith.addf %27, %29 : vector<8x256xf32>
    %c0_23 = arith.constant 0 : index
    %c0_24 = arith.constant 0 : index
    %31 = vector.load %arg10[%c0_23, %c0_24] : memref<8x256xf32, #tpu.memory_space<vmem>>, vector<8x256xf32>
    tpu.vector_store %arg10[%c0_23, %c0_24], %30 {strides = array<i32>} : memref<8x256xf32, #tpu.memory_space<vmem>>, vector<8x256xf32>,
    %c0_25 = arith.constant 0 : index
    %c0_26 = arith.constant 0 : index
    %32 = vector.load %arg11[%c0_25, %c0_26] : memref<8x128xf32, #tpu.memory_space<vmem>>, vector<8x128xf32>
    tpu.vector_store %arg11[%c0_25, %c0_26], %16 {strides = array<i32>} : memref<8x128xf32, #tpu.memory_space<vmem>>, vector<8x128xf32>,
    return
  }
  func.func @transform_0(%arg0: i32) -> (i32, i32) {
    %c0_i32 = arith.constant 0 : i32
    %c0_i32_0 = arith.constant 0 : i32
    return %arg0, %c0_i32 : i32, i32
  }
  func.func @transform_1(%arg0: i32) -> (i32, i32) {
    %c0_i32 = arith.constant 0 : i32
    %c0_i32_0 = arith.constant 0 : i32
    %c0_i32_1 = arith.constant 0 : i32
    return %c0_i32, %c0_i32_0 : i32, i32
  }
  func.func @transform_2(%arg0: i32) -> (i32, i32) {
    %c0_i32 = arith.constant 0 : i32
    %c0_i32_0 = arith.constant 0 : i32
    %c0_i32_1 = arith.constant 0 : i32
    return %c0_i32, %c0_i32_0 : i32, i32
  }
  func.func @transform_3(%arg0: i32) -> (i32, i32) {
    %c0_i32 = arith.constant 0 : i32
    %c0_i32_0 = arith.constant 0 : i32
    %c0_i32_1 = arith.constant 0 : i32
    return %c0_i32, %c0_i32_0 : i32, i32
  }
  func.func @transform_4(%arg0: i32) -> (i32, i32) {
    %c0_i32 = arith.constant 0 : i32
    %c0_i32_0 = arith.constant 0 : i32
    %c0_i32_1 = arith.constant 0 : i32
    return %c0_i32, %c0_i32_0 : i32, i32
  }
  func.func @transform_5(%arg0: i32) -> (i32, i32) {
    %c0_i32 = arith.constant 0 : i32
    %c0_i32_0 = arith.constant 0 : i32
    %c0_i32_1 = arith.constant 0 : i32
    return %c0_i32, %c0_i32_0 : i32, i32
  }
  func.func @transform_6(%arg0: i32) -> (i32, i32) {
    %c0_i32 = arith.constant 0 : i32
    %c0_i32_0 = arith.constant 0 : i32
    %c0_i32_1 = arith.constant 0 : i32
    return %c0_i32, %c0_i32_0 : i32, i32
  }
  func.func @transform_7(%arg0: i32) -> (i32, i32) {
    %c0_i32 = arith.constant 0 : i32
    %c0_i32_0 = arith.constant 0 : i32
    %c0_i32_1 = arith.constant 0 : i32
    return %c0_i32, %c0_i32_0 : i32, i32
  }
  func.func @transform_8(%arg0: i32) -> (i32, i32) {
    %c0_i32 = arith.constant 0 : i32
    %c0_i32_0 = arith.constant 0 : i32
    %c0_i32_1 = arith.constant 0 : i32
    return %c0_i32, %c0_i32_0 : i32, i32
  }
  func.func @transform_9(%arg0: i32) -> (i32, i32) {
    %c0_i32 = arith.constant 0 : i32
    %c0_i32_0 = arith.constant 0 : i32
    return %arg0, %c0_i32 : i32, i32
  }
  func.func @transform_10(%arg0: i32) -> (i32, i32) {
    %c0_i32 = arith.constant 0 : i32
    %c0_i32_0 = arith.constant 0 : i32
    return %arg0, %c0_i32 : i32, i32
  }
}

</mosaic_0001>

<bundles_post_ra>
// kernel: _forward.1
= control target key start
LH: loop header
LB: loop body
LE: loop exit
PB: predicated region body
PF: predicated region fallthrough
CT: control target
= control target key end

     0   :  { %16 = vsyncpa [#allocation3], 0  ;;  %s1191_s0 = inlined_call_operand.hbm [shape: f32[8,256], index: 0, kind: input, shape index: {}]   ;;  %s1192_s1 = inlined_call_operand.hbm [shape: bf16[256,128], index: 1, kind: input, shape index: {}]   ;;  %s1193_s2 = inlined_call_operand.vmem [shape: f32[1,128], index: 2, kind: input, shape index: {}]   ;;  %s1194_s3 = inlined_call_operand.hbm [shape: bf16[128,128], index: 3, kind: input, shape index: {}]   ;;  %s1195_s4 = inlined_call_operand.hbm [shape: f32[1,128], index: 4, kind: input, shape index: {}]   ;;  %s1196_s5 = inlined_call_operand.hbm [shape: bf16[128,128], index: 5, kind: input, shape index: {}]   ;;  %s1197_s6 = inlined_call_operand.vmem [shape: f32[1,128], index: 6, kind: input, shape index: {}]   ;;  %s1198_s7 = inlined_call_operand.hbm [shape: bf16[128,256], index: 7, kind: input, shape index: {}]   ;;  %s1199_s8 = inlined_call_operand.vmem [shape: f32[1,256], index: 8, kind: input, shape index: {}]   ;;  %s1200_s9 = inlined_call_operand.hbm [shape: f32[8,256], index: 9, kind: output, shape index: {0}]   ;;  %s1201_s10 = inlined_call_operand.hbm [shape: f32[8,128], index: 10, kind: output, shape index: {1}]  }
   0x1   :  { %17 = vsyncpa [#allocation6], 0 }
   0x2   :  { %18 = vsyncpa [#allocation9], 0 }
   0x3   :  { %19 = vsyncpa [#allocation12], 0 }
   0x4   :  { %20 = vsyncpa [#allocation4], 0  ;;  %s37_s15 = sshll.u32 %s1192_s1, 4  ;;  %s38_s15 = int_to_ptr.hbm [resolvable:$true] %s37_s15 }
   0x5   :  { %21 = vsyncpa [#allocation15], 0  ;;  %s1082_s16 = smov [#allocation5]   ;;  %s66_s20 = sshll.u32 %s1195_s4, 4  ;;  %s67_s20 = int_to_ptr.hbm [resolvable:$true] %s66_s20 }
   0x6   :  { %s39_s17 = sshll.u32 %s1082_s16, 4  ;;  %s1083_s21 = smov 64   ;;  %s40_s17 = int_to_ptr.vmem [resolvable:$true] %s39_s17 }
   0x7   :  { %s1084_s22 = smov 4   ;;  %s1085_s23 = smov [#allocation8]  }
   0x8   :  { %45 = dma.hbm_to_vmem [thread:$0]  %s38_s15, 2048, %s40_s17, [#allocation6], %s1083_s21, %s1083_s21, %s1084_s22  }
   0x9   :  { %s68_s24 = sshll.u32 %s1085_s23, 4  ;;  %s27_s26 = sshll.u32 %s1191_s0, 4  ;;  %s69_s24 = int_to_ptr.vmem [resolvable:$true] %s68_s24  ;;  %s28_s26 = int_to_ptr.hbm [resolvable:$true] %s27_s26 }
   0xa   :  { %71 = dma.hbm_to_vmem [thread:$0]  %s67_s20, 16, %s69_s24, [#allocation9]  }
   0xb   :  { %s52_s4 = sshll.u32 %s1194_s3, 4  ;;  %s1086_s29 = smov [#allocation2]   ;;  %s53_s4 = int_to_ptr.hbm [resolvable:$true] %s52_s4 }
   0xc   :  { %s29_s30 = sshll.u32 %s1086_s29, 4  ;;  %s1087_s11 = smov [#allocation7]   ;;  %s30_s30 = int_to_ptr.vmem [resolvable:$true] %s29_s30 }
   0xd   :  { %32 = dma.hbm_to_vmem [thread:$0]  %s28_s26, 256, %s30_s30, [#allocation3]  }
   0xe   :  { %s54_s12 = sshll.u32 %s1087_s11, 4  ;;  %s76_s15 = sshll.u32 %s1196_s5, 4  ;;  %s55_s12 = int_to_ptr.vmem [resolvable:$true] %s54_s12  ;;  %s77_s15 = int_to_ptr.hbm [resolvable:$true] %s76_s15 }
   0xf   :  { %60 = dma.hbm_to_vmem [thread:$0]  %s53_s4, 1024, %s55_s12, [#allocation6], %s1083_s21, %s1083_s21, %s1084_s22  }
  0x10   :  { %s91_s3 = sshll.u32 %s1198_s7, 4  ;;  %s1088_s17 = smov [#allocation10]   ;;  %s92_s3 = int_to_ptr.hbm [resolvable:$true] %s91_s3 }
  0x11   :  { %s78_s18 = sshll.u32 %s1088_s17, 4  ;;  %s1089_s19 = smov [#allocation11]   ;;  %s79_s18 = int_to_ptr.vmem [resolvable:$true] %s78_s18 }
  0x12   :  { %84 = dma.hbm_to_vmem [thread:$0]  %s77_s15, 1024, %s79_s18, [#allocation9], %s1083_s21, %s1083_s21, %s1084_s22  }
  0x13   :  { %s93_s5 = sshll.u32 %s1089_s19, 4  ;;  %s1090_s20 = smov 128   ;;  %s94_s5 = int_to_ptr.vmem [resolvable:$true] %s93_s5 }
  0x14   :  { %s1091_s23 = smov 8  }
  0x15   :  { %99 = dma.hbm_to_vmem [thread:$0]  %s92_s3, 2048, %s94_s5, [#allocation12], %s1090_s20, %s1090_s20, %s1091_s23  }
  0x16   :  { %1070 = dma.done.wait [#allocation3], 256  }
  0x17   :  { %1071 = vsyncadd [#allocation3], 4294967040 }
  0x18   :  { %1072 = dma.done.wait [#allocation6], 3072  }
  0x19   :  { %1073 = vsyncadd [#allocation6], 4294964224 }
  0x1a   :  { %1074 = dma.done.wait [#allocation9], 1040  }
  0x1b   :  { %1075 = vsyncadd [#allocation9], 4294966256 }
  0x1c   :  { %1076 = dma.done.wait [#allocation12], 2048  }
  0x1d   :  { %1077 = vsyncadd [#allocation12], 4294965248  ;;  %v822_v0 = vld [vmem:[#allocation5 + $0x38] sm:$0xff]  ;;  %v821_v2 = vld [vmem:[#allocation5 + $0x30] sm:$0xff]  ;;  %s1092_s24 = smov [#allocation14]   ;;  %s605_s27 = sshll.u32 %s1201_s10, 4  ;;  %s606_s27 = int_to_ptr.hbm [resolvable:$true] %s605_s27 }
  0x1e   :  { %v830_v1 = vld [vmem:[#allocation5 + $0x78] sm:$0xff]  ;;  %262 = vmatpush.bf16.msra.mxu0 %v822_v0  ;;  %v829_v3 = vld [vmem:[#allocation5 + $0x70] sm:$0xff]  ;;  %v820_v4 = vld [vmem:[#allocation5 + $0x28] sm:$0xff]  ;;  %s603_s25 = sshll.u32 %s1092_s24, 4  ;;  %s594_s12 = sshll.u32 %s1200_s9, 4  ;;  %s604_s25 = int_to_ptr.vmem [resolvable:$true] %s603_s25  ;;  %s595_s12 = int_to_ptr.hbm [resolvable:$true] %s594_s12 }
  0x1f   :  { %275 = vmatpush.bf16.msra.mxu1 %v830_v1  ;;  %v828_v5 = vld [vmem:[#allocation5 + $0x68] sm:$0xff]  ;;  %v838_v6 = vld [vmem:[#allocation7 + $0x38] sm:$0xff]  ;;  %v837_v7 = vld [vmem:[#allocation7 + $0x30] sm:$0xff] }
  0x20   :  { %358 = vmatpush.bf16.msra.mxu2 %v838_v6  ;;  %v819_v8 = vld [vmem:[#allocation5 + $0x20] sm:$0xff]  ;;  %v836_v10 = vld [vmem:[#allocation7 + $0x28] sm:$0xff]  ;;  %v818_v11 = vld [vmem:[#allocation5 + $0x18] sm:$0xff] }
  0x21   :  { %v827_v9 = vld [vmem:[#allocation5 + $0x60] sm:$0xff]  ;;  %v826_v12 = vld [vmem:[#allocation5 + $0x58] sm:$0xff]  ;;  %v817_v14 = vld [vmem:[#allocation5 + $0x10] sm:$0xff] }
  0x22   :  { %263 = vmatpush.bf16.msra.mxu0 %v821_v2  ;;  %v835_v13 = vld [vmem:[#allocation7 + $0x20] sm:$0xff]  ;;  %v825_v15 = vld [vmem:[#allocation5 + $0x50] sm:$0xff]  ;;  %v834_v16 = vld [vmem:[#allocation7 + $0x18] sm:$0xff] }
  0x23   :  { %276 = vmatpush.bf16.msra.mxu1 %v829_v3  ;;  %v816_v17 = vld [vmem:[#allocation5 + $0x8] sm:$0xff]  ;;  %v833_v19 = vld [vmem:[#allocation7 + $0x10] sm:$0xff]  ;;  %v815_v20 = vld [vmem:[#allocation5] sm:$0xff] }
  0x24   :  { %359 = vmatpush.bf16.msra.mxu2 %v837_v7  ;;  %v824_v18 = vld [vmem:[#allocation5 + $0x48] sm:$0xff]  ;;  %v823_v21 = vld [vmem:[#allocation5 + $0x40] sm:$0xff]  ;;  %v126_v22 = vld [vmem:[#allocation2] sm:$0xff] }
  0x25   :  { %v127_v23 = vld [vmem:[#allocation2 + $0x8] sm:$0xff]  ;;  %v128_v24 = vpack.c.bf16 %v126_v22, %v126_v22  ;;  %v832_v26 = vld [vmem:[#allocation7 + $0x8] sm:$0xff]  ;;  %v831_v27 = vld [vmem:[#allocation7] sm:$0xff] }
  0x26   :  { %264 = vmatpush.bf16.msra.mxu0 %v820_v4  ;;  %v129_v25 = vpack.c.bf16 %v127_v23, %v127_v23  ;;  %v846_v28 = vld [vmem:[#allocation10 + $0x38] sm:$0xff]  ;;  %v845_v29 = vld [vmem:[#allocation10 + $0x30] sm:$0xff]  ;;  %v844_v30 = vld [vmem:[#allocation10 + $0x28] sm:$0xff] }
  0x27   :  { %277 = vmatpush.bf16.msra.mxu1 %v828_v5  ;;  %441 = vmatpush.bf16.msra.mxu3 %v846_v28  ;;  %v843_v31 = vld [vmem:[#allocation10 + $0x20] sm:$0xff]  ;;  %v842_v32 = vld [vmem:[#allocation10 + $0x18] sm:$0xff]  ;;  %v841_v33 = vld [vmem:[#allocation10 + $0x10] sm:$0xff] }
  0x28   :  { %360 = vmatpush.bf16.msra.mxu2 %v836_v10  ;;  %v875_v34 = vld [vmem:[%s1193_s2] ss:$0 sm:$0xff]  ;;  %v839_v44 = vld [vmem:[#allocation10] sm:$0xff]  ;;  %v809_v45 = vld [vmem:[#allocation11 + $0x70] sm:$0xf] }
  0x29   :  { %v840_v43 = vld [vmem:[#allocation10 + $0x8] sm:$0xff]  ;;  %v862_v46 = vld [vmem:[#allocation11 + $0x74] sm:$0xf0]  ;;  %v861_v47 = vld [vmem:[#allocation11 + $0x74] sm:$0xf] }
  0x2a   :  { %265 = vmatpush.bf16.msra.mxu0 %v819_v8  ;;  %v810_v48 = vor.u32 %v862_v46, %v809_v45  ;;  %v811_v49 = vld [vmem:[#allocation11 + $0x78] sm:$0xf0]  ;;  %v801_v50 = vld [vmem:[#allocation11 + $0x60] sm:$0xf]  ;;  %v860_v51 = vld [vmem:[#allocation11 + $0x64] sm:$0xf0] }
  0x2b   :  { %278 = vmatpush.bf16.msra.mxu1 %v827_v9  ;;  %442 = vmatpush.bf16.msra.mxu3 %v845_v29  ;;  %v814_v52 = vor.u32 %v861_v47, %v811_v49  ;;  %v859_v53 = vld [vmem:[#allocation11 + $0x64] sm:$0xf]  ;;  %v803_v54 = vld [vmem:[#allocation11 + $0x68] sm:$0xf0]  ;;  %v802_v55 = vor.u32 %v860_v51, %v801_v50  ;;  %v793_v57 = vld [vmem:[#allocation11 + $0x50] sm:$0xf] }
  0x2c   :  { %361 = vmatpush.bf16.msra.mxu2 %v835_v13  ;;  %v806_v56 = vor.u32 %v859_v53, %v803_v54  ;;  %v858_v58 = vld [vmem:[#allocation11 + $0x54] sm:$0xf0]  ;;  %v857_v59 = vld [vmem:[#allocation11 + $0x54] sm:$0xf]  ;;  %v795_v60 = vld [vmem:[#allocation11 + $0x58] sm:$0xf0] }
  0x2d   :  { %v794_v61 = vor.u32 %v858_v58, %v793_v57  ;;  %v798_v62 = vor.u32 %v857_v59, %v795_v60  ;;  %v785_v63 = vld [vmem:[#allocation11 + $0x40] sm:$0xf]  ;;  %v856_v0 = vld [vmem:[#allocation11 + $0x44] sm:$0xf0]  ;;  %v855_v1 = vld [vmem:[#allocation11 + $0x44] sm:$0xf] }
  0x2e   :  { %266 = vmatpush.bf16.msra.mxu0 %v818_v11  ;;  %v787_v2 = vld [vmem:[#allocation11 + $0x48] sm:$0xf0]  ;;  %v786_v3 = vor.u32 %v856_v0, %v785_v63  ;;  %v777_v5 = vld [vmem:[#allocation11 + $0x30] sm:$0xf]  ;;  %v854_v6 = vld [vmem:[#allocation11 + $0x34] sm:$0xf0] }
  0x2f   :  { %279 = vmatpush.bf16.msra.mxu1 %v826_v12  ;;  %443 = vmatpush.bf16.msra.mxu3 %v844_v30  ;;  %v790_v4 = vor.u32 %v855_v1, %v787_v2  ;;  %v853_v7 = vld [vmem:[#allocation11 + $0x34] sm:$0xf]  ;;  %v779_v8 = vld [vmem:[#allocation11 + $0x38] sm:$0xf0]  ;;  %v778_v9 = vor.u32 %v854_v6, %v777_v5  ;;  %v769_v11 = vld [vmem:[#allocation11 + $0x20] sm:$0xf] }
  0x30   :  { %362 = vmatpush.bf16.msra.mxu2 %v834_v16  ;;  %v782_v10 = vor.u32 %v853_v7, %v779_v8  ;;  %v852_v12 = vld [vmem:[#allocation11 + $0x24] sm:$0xf0]  ;;  %v851_v13 = vld [vmem:[#allocation11 + $0x24] sm:$0xf]  ;;  %v761_v23 = vld [vmem:[#allocation11 + $0x10] sm:$0xf] }
  0x31   :  { %v753_v29 = vld [vmem:[#allocation11] sm:$0xf]  ;;  %v848_v30 = vld [vmem:[#allocation11 + $0x4] sm:$0xf0] }
  0x32   :  { %267 = vmatpush.bf16.msra.mxu0 %v817_v14  ;;  %v771_v14 = vld [vmem:[#allocation11 + $0x28] sm:$0xf0] }
  0x33   :  { %280 = vmatpush.bf16.msra.mxu1 %v825_v15  ;;  %444 = vmatpush.bf16.msra.mxu3 %v843_v31  ;;  %v770_v15 = vor.u32 %v852_v12, %v769_v11  ;;  %v774_v16 = vor.u32 %v851_v13, %v771_v14  ;;  %v847_v31 = vld [vmem:[#allocation11 + $0x4] sm:$0xf] }
  0x34   :  { %363 = vmatpush.bf16.msra.mxu2 %v833_v19 }
  0x36   :  { %268 = vmatpush.bf16.msra.mxu0 %v816_v17  ;;  %v876_v17 = vld [vmem:[#allocation8] ss:$0 sm:$0xff] }
  0x37   :  { %281 = vmatpush.bf16.msra.mxu1 %v824_v18  ;;  %445 = vmatpush.bf16.msra.mxu3 %v842_v32  ;;  %v754_v32 = vor.u32 %v848_v30, %v753_v29 }
  0x38   :  { %364 = vmatpush.bf16.msra.mxu2 %v832_v26 }
  0x3a   :  { %269 = vmatpush.bf16.msra.mxu0 %v815_v20 }
  0x3b   :  { %282 = vmatpush.bf16.msra.mxu1 %v823_v21  ;;  %446 = vmatpush.bf16.msra.mxu3 %v841_v33  ;;  %v755_v33 = vld [vmem:[#allocation11 + $0x8] sm:$0xf0] }
  0x3c   :  { %365 = vmatpush.bf16.msra.mxu2 %v831_v27  ;;  %v763_v27 = vld [vmem:[#allocation11 + $0x18] sm:$0xf0] }
  0x3d   :  { %270 = vmatmul.bf16.vlgmr.msra.gmra.mxu0 %v128_v24  ;;  %v850_v24 = vld [vmem:[#allocation11 + $0x14] sm:$0xf0] }
  0x3e   :  { %283 = vmatmul.bf16.vlgmr.msra.gmra.mxu1 %v129_v25  ;;  %558 = vmatpush.bf16.msrb.mxu0 %v810_v48  ;;  %v849_v25 = vld [vmem:[#allocation11 + $0x14] sm:$0xf]  ;;  %v762_v26 = vor.u32 %v850_v24, %v761_v23 }
  0x3f   :  { %447 = vmatpush.bf16.msra.mxu3 %v840_v43  ;;  %571 = vmatpush.bf16.msrb.mxu1 %v814_v52  ;;  %v766_v28 = vor.u32 %v849_v25, %v763_v27 }
  0x42   :  { %559 = vmatpush.bf16.msrb.mxu0 %v802_v55 }
  0x43   :  { %448 = vmatpush.bf16.msra.mxu3 %v839_v44  ;;  %572 = vmatpush.bf16.msrb.mxu1 %v806_v56 }
  0x46   :  { %560 = vmatpush.bf16.msrb.mxu0 %v794_v61 }
  0x47   :  { %573 = vmatpush.bf16.msrb.mxu1 %v798_v62 }
  0x4a   :  { %561 = vmatpush.bf16.msrb.mxu0 %v786_v3 }
  0x4b   :  { %574 = vmatpush.bf16.msrb.mxu1 %v790_v4 }
  0x4e   :  { %562 = vmatpush.bf16.msrb.mxu0 %v778_v9 }
  0x4f   :  { %575 = vmatpush.bf16.msrb.mxu1 %v782_v10 }
  0x52   :  { %563 = vmatpush.bf16.msrb.mxu0 %v770_v15 }
  0x53   :  { %576 = vmatpush.bf16.msrb.mxu1 %v774_v16 }
  0x56   :  { %564 = vmatpush.bf16.msrb.mxu0 %v762_v26 }
  0x57   :  { %577 = vmatpush.bf16.msrb.mxu1 %v766_v28 }
  0x5a   :  { %565 = vmatpush.bf16.msrb.mxu0 %v754_v32 }
  0xba   :  { %v271_v35 = vpop.f32.mrf.mxu0 }
  0xbb   :  { %v284_v36 = vpop.f32.mrf.mxu1  ;;  %v272_v37 = vadd.f32 %v875_v34, %v271_v35  ;;  %v758_v34 = vor.u32 %v847_v31, %v755_v33  ;;  %v877_v35 = vld [vmem:[%s1197_s6] ss:$0 sm:$0xff]  ;;  %s1093_s6 = smov [#allocation13]  }
  0xbc   :  { %s592_s29 = sshll.u32 %s1093_s6, 4  ;;  %s593_s29 = int_to_ptr.vmem [resolvable:$true] %s592_s29 }
  0xbd   :  { %v285_v38 = vadd.f32 %v284_v36, %v272_v37  ;;  %578 = vmatpush.bf16.msrb.mxu1 %v758_v34 }
  0xbf   :  { %v288_v39 = vmax.f32 %v285_v38, 0.0 }
  0xc1   :  { %v289_v40 = vpack.c.bf16 %v288_v39, %v288_v39 }
  0xc2   :  { %v273_v41 = vpop.f32.mrf.mxu0 }
  0xc3   :  { %v286_v42 = vpop.f32.mrf.mxu1  ;;  %366 = vmatmul.bf16.vlgmr.msra.gmra.mxu2 %v289_v40  ;;  %v472_v41 = vld [vmem:[%s1199_s8] sm:$0x3] }
  0xc4   :  { %v474_v42 = vperm.slane %v472_v41, 0  ;;  %v475_v43 = vperm.slane %v472_v41, 1 }
 0x146   :  { %v367_v18 = vpop.f32.mrf.mxu2 }
 0x147   :  { %v368_v19 = vadd.f32 %v876_v17, %v367_v18 }
 0x149   :  { %v371_v20 = vmax.f32 %v368_v19, 0.0 }
 0x14b   :  { %586 = vst [vmem:[#allocation14] sm:$0xff] %v371_v20  ;;  %v372_v21 = vpack.c.bf16 %v371_v20, %v371_v20 }
 0x14c   :  { %608 = dma.vmem_to_hbm [thread:$0]  %s604_s25, 128, %s606_s27, [#allocation15]  }
 0x14d   :  { %449 = vmatmul.bf16.vlgmr.msra.gmra.mxu3 %v372_v21 }
 0x14e   :  { %v369_v22 = vpop.f32.mrf.mxu2 }
 0x1d0   :  { %v450_v36 = vpop.f32.mrf.mxu3 }
 0x1d1   :  { %v451_v37 = vadd.f32 %v877_v35, %v450_v36 }
 0x1d3   :  { %v454_v38 = vmax.f32 %v451_v37, 0.0 }
 0x1d5   :  { %v455_v39 = vpack.c.bf16 %v454_v38, %v454_v38 }
 0x1d7   :  { %566 = vmatmul.bf16.vlgmr.msrb.gmra.mxu0 %v455_v39  ;;  %579 = vmatmul.bf16.vlgmr.msrb.gmra.mxu1 %v455_v39 }
 0x1d8   :  { %v452_v40 = vpop.f32.mrf.mxu3 }
 0x254   :  { %v567_v44 = vpop.f32.mrf.mxu0  ;;  %v580_v45 = vpop.f32.mrf.mxu1 }
 0x255   :  { %v568_v46 = vadd.f32 %v567_v44, %v474_v42  ;;  %v581_v47 = vadd.f32 %v580_v45, %v475_v43 }
 0x257   :  { %584 = vst [vmem:[#allocation13] sm:$0xff] %v568_v46 }
 0x258   :  { %585 = vst [vmem:[#allocation13 + $0x8] sm:$0xff] %v581_v47 }
 0x259   :  { %597 = dma.vmem_to_hbm [thread:$0]  %s593_s29, 256, %s595_s12, [#allocation4]  }
 0x25c   :  { %v569_v48 = vpop.f32.mrf.mxu0  ;;  %v582_v49 = vpop.f32.mrf.mxu1 }
 0x25d   :  { %1078 = dma.done.wait [#allocation4], 256  }
 0x25e   :  { %1079 = vsyncadd [#allocation4], 4294967040 }
 0x25f   :  { %1080 = dma.done.wait [#allocation15], 128  }
 0x260   :  { %1081 = vsyncadd [#allocation15], 4294967168 }
 0x261   :  { %617 = vsyncpa [#allocation3], 1 }
 0x262   :  { %618 = vsyncpa [#allocation6], 1 }
 0x263   :  { %619 = vsyncpa [#allocation9], 1 }
 0x264   :  { %620 = vsyncpa [#allocation12], 1 }
 0x265   :  { %621 = vsyncpa [#allocation4], 1 }
 0x266   :  { %622 = vsyncpa [#allocation15], 1 }

// kernel: _forward.1
= control target key start
LH: loop header
LB: loop body
LE: loop exit
PB: predicated region body
PF: predicated region fallthrough
CT: control target
= control target key end

     0   :  { %16 = vsyncpa [#allocation3], 0  ;;  %s1191_s0 = inlined_call_operand.hbm [shape: f32[8,256], index: 0, kind: input, shape index: {}]   ;;  %s1192_s1 = inlined_call_operand.hbm [shape: bf16[256,128], index: 1, kind: input, shape index: {}]   ;;  %s1193_s2 = inlined_call_operand.vmem [shape: f32[1,128], index: 2, kind: input, shape index: {}]   ;;  %s1194_s3 = inlined_call_operand.hbm [shape: bf16[128,128], index: 3, kind: input, shape index: {}]   ;;  %s1195_s4 = inlined_call_operand.hbm [shape: f32[1,128], index: 4, kind: input, shape index: {}]   ;;  %s1196_s5 = inlined_call_operand.hbm [shape: bf16[128,128], index: 5, kind: input, shape index: {}]   ;;  %s1197_s6 = inlined_call_operand.vmem [shape: f32[1,128], index: 6, kind: input, shape index: {}]   ;;  %s1198_s7 = inlined_call_operand.hbm [shape: bf16[128,256], index: 7, kind: input, shape index: {}]   ;;  %s1199_s8 = inlined_call_operand.vmem [shape: f32[1,256], index: 8, kind: input, shape index: {}]   ;;  %s1200_s9 = inlined_call_operand.hbm [shape: f32[8,256], index: 9, kind: output, shape index: {0}]   ;;  %s1201_s10 = inlined_call_operand.hbm [shape: f32[8,128], index: 10, kind: output, shape index: {1}]  }
   0x1   :  { %17 = vsyncpa [#allocation6], 0 }
   0x2   :  { %18 = vsyncpa [#allocation9], 0 }
   0x3   :  { %19 = vsyncpa [#allocation12], 0 }
   0x4   :  { %20 = vsyncpa [#allocation4], 0  ;;  %s37_s15 = sshll.u32 %s1192_s1, 4  ;;  %s38_s15 = int_to_ptr.hbm [resolvable:$true] %s37_s15 }
   0x5   :  { %21 = vsyncpa [#allocation15], 0  ;;  %s1082_s16 = smov [#allocation5]   ;;  %s66_s20 = sshll.u32 %s1195_s4, 4  ;;  %s67_s20 = int_to_ptr.hbm [resolvable:$true] %s66_s20 }
   0x6   :  { %s39_s17 = sshll.u32 %s1082_s16, 4  ;;  %s1083_s21 = smov 64   ;;  %s40_s17 = int_to_ptr.vmem [resolvable:$true] %s39_s17 }
   0x7   :  { %s1084_s22 = smov 4   ;;  %s1085_s23 = smov [#allocation8]  }
   0x8   :  { %45 = dma.hbm_to_vmem [thread:$0]  %s38_s15, 2048, %s40_s17, [#allocation6], %s1083_s21, %s1083_s21, %s1084_s22  }
   0x9   :  { %s68_s24 = sshll.u32 %s1085_s23, 4  ;;  %s27_s26 = sshll.u32 %s1191_s0, 4  ;;  %s69_s24 = int_to_ptr.vmem [resolvable:$true] %s68_s24  ;;  %s28_s26 = int_to_ptr.hbm [resolvable:$true] %s27_s26 }
   0xa   :  { %71 = dma.hbm_to_vmem [thread:$0]  %s67_s20, 16, %s69_s24, [#allocation9]  }
   0xb   :  { %s52_s4 = sshll.u32 %s1194_s3, 4  ;;  %s1086_s29 = smov [#allocation2]   ;;  %s53_s4 = int_to_ptr.hbm [resolvable:$true] %s52_s4 }
   0xc   :  { %s29_s30 = sshll.u32 %s1086_s29, 4  ;;  %s1087_s11 = smov [#allocation7]   ;;  %s30_s30 = int_to_ptr.vmem [resolvable:$true] %s29_s30 }
   0xd   :  { %32 = dma.hbm_to_vmem [thread:$0]  %s28_s26, 256, %s30_s30, [#allocation3]  }
   0xe   :  { %s54_s12 = sshll.u32 %s1087_s11, 4  ;;  %s76_s15 = sshll.u32 %s1196_s5, 4  ;;  %s55_s12 = int_to_ptr.vmem [resolvable:$true] %s54_s12  ;;  %s77_s15 = int_to_ptr.hbm [resolvable:$true] %s76_s15 }
   0xf   :  { %60 = dma.hbm_to_vmem [thread:$0]  %s53_s4, 1024, %s55_s12, [#allocation6], %s1083_s21, %s1083_s21, %s1084_s22  }
  0x10   :  { %s91_s3 = sshll.u32 %s1198_s7, 4  ;;  %s1088_s17 = smov [#allocation10]   ;;  %s92_s3 = int_to_ptr.hbm [resolvable:$true] %s91_s3 }
  0x11   :  { %s78_s18 = sshll.u32 %s1088_s17, 4  ;;  %s1089_s19 = smov [#allocation11]   ;;  %s79_s18 = int_to_ptr.vmem [resolvable:$true] %s78_s18 }
  0x12   :  { %84 = dma.hbm_to_vmem [thread:$0]  %s77_s15, 1024, %s79_s18, [#allocation9], %s1083_s21, %s1083_s21, %s1084_s22  }
  0x13   :  { %s93_s5 = sshll.u32 %s1089_s19, 4  ;;  %s1090_s20 = smov 128   ;;  %s94_s5 = int_to_ptr.vmem [resolvable:$true] %s93_s5 }
  0x14   :  { %s1091_s23 = smov 8  }
  0x15   :  { %99 = dma.hbm_to_vmem [thread:$0]  %s92_s3, 2048, %s94_s5, [#allocation12], %s1090_s20, %s1090_s20, %s1091_s23  }
  0x16   :  { %1070 = dma.done.wait [#allocation3], 256  }
  0x17   :  { %1071 = vsyncadd [#allocation3], 4294967040 }
  0x18   :  { %1072 = dma.done.wait [#allocation6], 3072  }
  0x19   :  { %1073 = vsyncadd [#allocation6], 4294964224 }
  0x1a   :  { %1074 = dma.done.wait [#allocation9], 1040  }
  0x1b   :  { %1075 = vsyncadd [#allocation9], 4294966256 }
  0x1c   :  { %1076 = dma.done.wait [#allocation12], 2048  }
  0x1d   :  { %1077 = vsyncadd [#allocation12], 4294965248  ;;  %v822_v0 = vld [vmem:[#allocation5 + $0x38] sm:$0xff]  ;;  %v821_v2 = vld [vmem:[#allocation5 + $0x30] sm:$0xff]  ;;  %s1092_s24 = smov [#allocation14]   ;;  %s605_s27 = sshll.u32 %s1201_s10, 4  ;;  %s606_s27 = int_to_ptr.hbm [resolvable:$true] %s605_s27 }
  0x1e   :  { %v830_v1 = vld [vmem:[#allocation5 + $0x78] sm:$0xff]  ;;  %262 = vmatpush.bf16.msra.mxu0 %v822_v0  ;;  %v829_v3 = vld [vmem:[#allocation5 + $0x70] sm:$0xff]  ;;  %v820_v4 = vld [vmem:[#allocation5 + $0x28] sm:$0xff]  ;;  %s603_s25 = sshll.u32 %s1092_s24, 4  ;;  %s594_s12 = sshll.u32 %s1200_s9, 4  ;;  %s604_s25 = int_to_ptr.vmem [resolvable:$true] %s603_s25  ;;  %s595_s12 = int_to_ptr.hbm [resolvable:$true] %s594_s12 }
  0x1f   :  { %275 = vmatpush.bf16.msra.mxu1 %v830_v1  ;;  %v828_v5 = vld [vmem:[#allocation5 + $0x68] sm:$0xff]  ;;  %v838_v6 = vld [vmem:[#allocation7 + $0x38] sm:$0xff]  ;;  %v837_v7 = vld [vmem:[#allocation7 + $0x30] sm:$0xff] }
  0x20   :  { %358 = vmatpush.bf16.msra.mxu2 %v838_v6  ;;  %v819_v8 = vld [vmem:[#allocation5 + $0x20] sm:$0xff]  ;;  %v836_v10 = vld [vmem:[#allocation7 + $0x28] sm:$0xff]  ;;  %v818_v11 = vld [vmem:[#allocation5 + $0x18] sm:$0xff] }
  0x21   :  { %v827_v9 = vld [vmem:[#allocation5 + $0x60] sm:$0xff]  ;;  %v826_v12 = vld [vmem:[#allocation5 + $0x58] sm:$0xff]  ;;  %v817_v14 = vld [vmem:[#allocation5 + $0x10] sm:$0xff] }
  0x22   :  { %263 = vmatpush.bf16.msra.mxu0 %v821_v2  ;;  %v835_v13 = vld [vmem:[#allocation7 + $0x20] sm:$0xff]  ;;  %v825_v15 = vld [vmem:[#allocation5 + $0x50] sm:$0xff]  ;;  %v834_v16 = vld [vmem:[#allocation7 + $0x18] sm:$0xff] }
  0x23   :  { %276 = vmatpush.bf16.msra.mxu1 %v829_v3  ;;  %v816_v17 = vld [vmem:[#allocation5 + $0x8] sm:$0xff]  ;;  %v833_v19 = vld [vmem:[#allocation7 + $0x10] sm:$0xff]  ;;  %v815_v20 = vld [vmem:[#allocation5] sm:$0xff] }
  0x24   :  { %359 = vmatpush.bf16.msra.mxu2 %v837_v7  ;;  %v824_v18 = vld [vmem:[#allocation5 + $0x48] sm:$0xff]  ;;  %v823_v21 = vld [vmem:[#allocation5 + $0x40] sm:$0xff]  ;;  %v126_v22 = vld [vmem:[#allocation2] sm:$0xff] }
  0x25   :  { %v127_v23 = vld [vmem:[#allocation2 + $0x8] sm:$0xff]  ;;  %v128_v24 = vpack.c.bf16 %v126_v22, %v126_v22  ;;  %v832_v26 = vld [vmem:[#allocation7 + $0x8] sm:$0xff]  ;;  %v831_v27 = vld [vmem:[#allocation7] sm:$0xff] }
  0x26   :  { %264 = vmatpush.bf16.msra.mxu0 %v820_v4  ;;  %v129_v25 = vpack.c.bf16 %v127_v23, %v127_v23  ;;  %v846_v28 = vld [vmem:[#allocation10 + $0x38] sm:$0xff]  ;;  %v845_v29 = vld [vmem:[#allocation10 + $0x30] sm:$0xff]  ;;  %v844_v30 = vld [vmem:[#allocation10 + $0x28] sm:$0xff] }
  0x27   :  { %277 = vmatpush.bf16.msra.mxu1 %v828_v5  ;;  %441 = vmatpush.bf16.msra.mxu3 %v846_v28  ;;  %v843_v31 = vld [vmem:[#allocation10 + $0x20] sm:$0xff]  ;;  %v842_v32 = vld [vmem:[#allocation10 + $0x18] sm:$0xff]  ;;  %v841_v33 = vld [vmem:[#allocation10 + $0x10] sm:$0xff] }
  0x28   :  { %360 = vmatpush.bf16.msra.mxu2 %v836_v10  ;;  %v875_v34 = vld [vmem:[%s1193_s2] ss:$0 sm:$0xff]  ;;  %v839_v44 = vld [vmem:[#allocation10] sm:$0xff]  ;;  %v809_v45 = vld [vmem:[#allocation11 + $0x70] sm:$0xf] }
  0x29   :  { %v840_v43 = vld [vmem:[#allocation10 + $0x8] sm:$0xff]  ;;  %v862_v46 = vld [vmem:[#allocation11 + $0x74] sm:$0xf0]  ;;  %v861_v47 = vld [vmem:[#allocation11 + $0x74] sm:$0xf] }
  0x2a   :  { %265 = vmatpush.bf16.msra.mxu0 %v819_v8  ;;  %v810_v48 = vor.u32 %v862_v46, %v809_v45  ;;  %v811_v49 = vld [vmem:[#allocation11 + $0x78] sm:$0xf0]  ;;  %v801_v50 = vld [vmem:[#allocation11 + $0x60] sm:$0xf]  ;;  %v860_v51 = vld [vmem:[#allocation11 + $0x64] sm:$0xf0] }
  0x2b   :  { %278 = vmatpush.bf16.msra.mxu1 %v827_v9  ;;  %442 = vmatpush.bf16.msra.mxu3 %v845_v29  ;;  %v814_v52 = vor.u32 %v861_v47, %v811_v49  ;;  %v859_v53 = vld [vmem:[#allocation11 + $0x64] sm:$0xf]  ;;  %v803_v54 = vld [vmem:[#allocation11 + $0x68] sm:$0xf0]  ;;  %v802_v55 = vor.u32 %v860_v51, %v801_v50  ;;  %v793_v57 = vld [vmem:[#allocation11 + $0x50] sm:$0xf] }
  0x2c   :  { %361 = vmatpush.bf16.msra.mxu2 %v835_v13  ;;  %v806_v56 = vor.u32 %v859_v53, %v803_v54  ;;  %v858_v58 = vld [vmem:[#allocation11 + $0x54] sm:$0xf0]  ;;  %v857_v59 = vld [vmem:[#allocation11 + $0x54] sm:$0xf]  ;;  %v795_v60 = vld [vmem:[#allocation11 + $0x58] sm:$0xf0] }
  0x2d   :  { %v794_v61 = vor.u32 %v858_v58, %v793_v57  ;;  %v798_v62 = vor.u32 %v857_v59, %v795_v60  ;;  %v785_v63 = vld [vmem:[#allocation11 + $0x40] sm:$0xf]  ;;  %v856_v0 = vld [vmem:[#allocation11 + $0x44] sm:$0xf0]  ;;  %v855_v1 = vld [vmem:[#allocation11 + $0x44] sm:$0xf] }
  0x2e   :  { %266 = vmatpush.bf16.msra.mxu0 %v818_v11  ;;  %v787_v2 = vld [vmem:[#allocation11 + $0x48] sm:$0xf0]  ;;  %v786_v3 = vor.u32 %v856_v0, %v785_v63  ;;  %v777_v5 = vld [vmem:[#allocation11 + $0x30] sm:$0xf]  ;;  %v854_v6 = vld [vmem:[#allocation11 + $0x34] sm:$0xf0] }
  0x2f   :  { %279 = vmatpush.bf16.msra.mxu1 %v826_v12  ;;  %443 = vmatpush.bf16.msra.mxu3 %v844_v30  ;;  %v790_v4 = vor.u32 %v855_v1, %v787_v2  ;;  %v853_v7 = vld [vmem:[#allocation11 + $0x34] sm:$0xf]  ;;  %v779_v8 = vld [vmem:[#allocation11 + $0x38] sm:$0xf0]  ;;  %v778_v9 = vor.u32 %v854_v6, %v777_v5  ;;  %v769_v11 = vld [vmem:[#allocation11 + $0x20] sm:$0xf] }
  0x30   :  { %362 = vmatpush.bf16.msra.mxu2 %v834_v16  ;;  %v782_v10 = vor.u32 %v853_v7, %v779_v8  ;;  %v852_v12 = vld [vmem:[#allocation11 + $0x24] sm:$0xf0]  ;;  %v851_v13 = vld [vmem:[#allocation11 + $0x24] sm:$0xf]  ;;  %v761_v23 = vld [vmem:[#allocation11 + $0x10] sm:$0xf] }
  0x31   :  { %v753_v29 = vld [vmem:[#allocation11] sm:$0xf]  ;;  %v848_v30 = vld [vmem:[#allocation11 + $0x4] sm:$0xf0] }
  0x32   :  { %267 = vmatpush.bf16.msra.mxu0 %v817_v14  ;;  %v771_v14 = vld [vmem:[#allocation11 + $0x28] sm:$0xf0] }
  0x33   :  { %280 = vmatpush.bf16.msra.mxu1 %v825_v15  ;;  %444 = vmatpush.bf16.msra.mxu3 %v843_v31  ;;  %v770_v15 = vor.u32 %v852_v12, %v769_v11  ;;  %v774_v16 = vor.u32 %v851_v13, %v771_v14  ;;  %v847_v31 = vld [vmem:[#allocation11 + $0x4] sm:$0xf] }
  0x34   :  { %363 = vmatpush.bf16.msra.mxu2 %v833_v19 }
  0x36   :  { %268 = vmatpush.bf16.msra.mxu0 %v816_v17  ;;  %v876_v17 = vld [vmem:[#allocation8] ss:$0 sm:$0xff] }
  0x37   :  { %281 = vmatpush.bf16.msra.mxu1 %v824_v18  ;;  %445 = vmatpush.bf16.msra.mxu3 %v842_v32  ;;  %v754_v32 = vor.u32 %v848_v30, %v753_v29 }
  0x38   :  { %364 = vmatpush.bf16.msra.mxu2 %v832_v26 }
  0x3a   :  { %269 = vmatpush.bf16.msra.mxu0 %v815_v20 }
  0x3b   :  { %282 = vmatpush.bf16.msra.mxu1 %v823_v21  ;;  %446 = vmatpush.bf16.msra.mxu3 %v841_v33  ;;  %v755_v33 = vld [vmem:[#allocation11 + $0x8] sm:$0xf0] }
  0x3c   :  { %365 = vmatpush.bf16.msra.mxu2 %v831_v27  ;;  %v763_v27 = vld [vmem:[#allocation11 + $0x18] sm:$0xf0] }
  0x3d   :  { %270 = vmatmul.bf16.vlgmr.msra.gmra.mxu0 %v128_v24  ;;  %v850_v24 = vld [vmem:[#allocation11 + $0x14] sm:$0xf0] }
  0x3e   :  { %283 = vmatmul.bf16.vlgmr.msra.gmra.mxu1 %v129_v25  ;;  %558 = vmatpush.bf16.msrb.mxu0 %v810_v48  ;;  %v849_v25 = vld [vmem:[#allocation11 + $0x14] sm:$0xf]  ;;  %v762_v26 = vor.u32 %v850_v24, %v761_v23 }
  0x3f   :  { %447 = vmatpush.bf16.msra.mxu3 %v840_v43  ;;  %571 = vmatpush.bf16.msrb.mxu1 %v814_v52  ;;  %v766_v28 = vor.u32 %v849_v25, %v763_v27 }
  0x42   :  { %559 = vmatpush.bf16.msrb.mxu0 %v802_v55 }
  0x43   :  { %448 = vmatpush.bf16.msra.mxu3 %v839_v44  ;;  %572 = vmatpush.bf16.msrb.mxu1 %v806_v56 }
  0x46   :  { %560 = vmatpush.bf16.msrb.mxu0 %v794_v61 }
  0x47   :  { %573 = vmatpush.bf16.msrb.mxu1 %v798_v62 }
  0x4a   :  { %561 = vmatpush.bf16.msrb.mxu0 %v786_v3 }
  0x4b   :  { %574 = vmatpush.bf16.msrb.mxu1 %v790_v4 }
  0x4e   :  { %562 = vmatpush.bf16.msrb.mxu0 %v778_v9 }
  0x4f   :  { %575 = vmatpush.bf16.msrb.mxu1 %v782_v10 }
  0x52   :  { %563 = vmatpush.bf16.msrb.mxu0 %v770_v15 }
  0x53   :  { %576 = vmatpush.bf16.msrb.mxu1 %v774_v16 }
  0x56   :  { %564 = vmatpush.bf16.msrb.mxu0 %v762_v26 }
  0x57   :  { %577 = vmatpush.bf16.msrb.mxu1 %v766_v28 }
  0x5a   :  { %565 = vmatpush.bf16.msrb.mxu0 %v754_v32 }
  0xba   :  { %v271_v35 = vpop.f32.mrf.mxu0 }
  0xbb   :  { %v284_v36 = vpop.f32.mrf.mxu1  ;;  %v272_v37 = vadd.f32 %v875_v34, %v271_v35  ;;  %v758_v34 = vor.u32 %v847_v31, %v755_v33  ;;  %v877_v35 = vld [vmem:[%s1197_s6] ss:$0 sm:$0xff]  ;;  %s1093_s6 = smov [#allocation13]  }
  0xbc   :  { %s592_s29 = sshll.u32 %s1093_s6, 4  ;;  %s593_s29 = int_to_ptr.vmem [resolvable:$true] %s592_s29 }
  0xbd   :  { %v285_v38 = vadd.f32 %v284_v36, %v272_v37  ;;  %578 = vmatpush.bf16.msrb.mxu1 %v758_v34 }
  0xbf   :  { %v288_v39 = vmax.f32 %v285_v38, 0.0 }
  0xc1   :  { %v289_v40 = vpack.c.bf16 %v288_v39, %v288_v39 }
  0xc2   :  { %v273_v41 = vpop.f32.mrf.mxu0 }
  0xc3   :  { %v286_v42 = vpop.f32.mrf.mxu1  ;;  %366 = vmatmul.bf16.vlgmr.msra.gmra.mxu2 %v289_v40  ;;  %v472_v41 = vld [vmem:[%s1199_s8] sm:$0x3] }
  0xc4   :  { %v474_v42 = vperm.slane %v472_v41, 0  ;;  %v475_v43 = vperm.slane %v472_v41, 1 }
 0x146   :  { %v367_v18 = vpop.f32.mrf.mxu2 }
 0x147   :  { %v368_v19 = vadd.f32 %v876_v17, %v367_v18 }
 0x149   :  { %v371_v20 = vmax.f32 %v368_v19, 0.0 }
 0x14b   :  { %586 = vst [vmem:[#allocation14] sm:$0xff] %v371_v20  ;;  %v372_v21 = vpack.c.bf16 %v371_v20, %v371_v20 }
 0x14c   :  { %608 = dma.vmem_to_hbm [thread:$0]  %s604_s25, 128, %s606_s27, [#allocation15]  }
 0x14d   :  { %449 = vmatmul.bf16.vlgmr.msra.gmra.mxu3 %v372_v21 }
 0x14e   :  { %v369_v22 = vpop.f32.mrf.mxu2 }
 0x1d0   :  { %v450_v36 = vpop.f32.mrf.mxu3 }
 0x1d1   :  { %v451_v37 = vadd.f32 %v877_v35, %v450_v36 }
 0x1d3   :  { %v454_v38 = vmax.f32 %v451_v37, 0.0 }
 0x1d5   :  { %v455_v39 = vpack.c.bf16 %v454_v38, %v454_v38 }
 0x1d7   :  { %566 = vmatmul.bf16.vlgmr.msrb.gmra.mxu0 %v455_v39  ;;  %579 = vmatmul.bf16.vlgmr.msrb.gmra.mxu1 %v455_v39 }
 0x1d8   :  { %v452_v40 = vpop.f32.mrf.mxu3 }
 0x254   :  { %v567_v44 = vpop.f32.mrf.mxu0  ;;  %v580_v45 = vpop.f32.mrf.mxu1 }
 0x255   :  { %v568_v46 = vadd.f32 %v567_v44, %v474_v42  ;;  %v581_v47 = vadd.f32 %v580_v45, %v475_v43 }
 0x257   :  { %584 = vst [vmem:[#allocation13] sm:$0xff] %v568_v46 }
 0x258   :  { %585 = vst [vmem:[#allocation13 + $0x8] sm:$0xff] %v581_v47 }
 0x259   :  { %597 = dma.vmem_to_hbm [thread:$0]  %s593_s29, 256, %s595_s12, [#allocation4]  }
 0x25c   :  { %v569_v48 = vpop.f32.mrf.mxu0  ;;  %v582_v49 = vpop.f32.mrf.mxu1 }
 0x25d   :  { %1078 = dma.done.wait [#allocation4], 256  }
 0x25e   :  { %1079 = vsyncadd [#allocation4], 4294967040 }
 0x25f   :  { %1080 = dma.done.wait [#allocation15], 128  }
 0x260   :  { %1081 = vsyncadd [#allocation15], 4294967168 }
 0x261   :  { %617 = vsyncpa [#allocation3], 1 }
 0x262   :  { %618 = vsyncpa [#allocation6], 1 }
 0x263   :  { %619 = vsyncpa [#allocation9], 1 }
 0x264   :  { %620 = vsyncpa [#allocation12], 1 }
 0x265   :  { %621 = vsyncpa [#allocation4], 1 }
 0x266   :  { %622 = vsyncpa [#allocation15], 1 }

</bundles_post_ra>
